<compile_context>
chip_gen: v7x
topology: tpu7x:2x2x1
jax: 0.10.0
libtpu: 0.0.40
codegen_flags: <defaults>
</compile_context>

<pallas_src>
import numpy as np
import jax
import jax.numpy as jnp
from jax.experimental import pallas as pl
from jax.experimental.pallas import tpu as pltpu


def _round_up(x, m):
    return (x + m - 1) // m * m


def _softplus(x):
    # Numerically stable softplus; differs from F.softplus(threshold=20) only
    # at ~1e-9 level.
    return jnp.maximum(x, 0.0) + jnp.log(1.0 + jnp.exp(-jnp.abs(x)))


def _conv5x5_taps(s):
    """Static tap offsets + boundary masks for a 5x5 'same' (padding=2)
    single-channel cross-correlation on an s x s image stored row-major."""
    pp = np.arange(s * s)
    ii, jj = pp // s, pp % s
    offsets, masks = [], []
    for ki in range(5):
        for kj in range(5):
            di, dj = ki - 2, kj - 2
            offsets.append(di * s + dj)
            masks.append(((ii + di >= 0) & (ii + di < s) &
                          (jj + dj >= 0) & (jj + dj < s)).astype(np.float32))
    return tuple(offsets), np.stack(masks)            # (25,), (25, s*s)


def _make_netg_kernel(num_linear, smooth, s, tap_offsets):
    """Fused kernel: (matmul + bias + softplus) x num_linear, then the optional
    5x5 smoothing conv done as 25 masked lane rolls + bias + softplus."""
    L2 = s * s

    def kernel(x_ref, *refs):
        o_ref = refs[-1]
        params = refs[:-1]
        h = x_ref[...].astype(jnp.bfloat16)           # bf16 operands, f32 accum
        a = None
        p = 0
        for _ in range(num_linear):
            w = params[p][...]                        # (in, out)  bf16, resident
            b = params[p + 1][...]                    # (1, out)   f32, resident
            p += 2
            z = jnp.dot(h, w, preferred_element_type=jnp.float32) + b
            a = _softplus(z)                          # f32
            h = a.astype(jnp.bfloat16)
        if smooth:
            mw = params[p][...]                       # (25, L2) f32 masked tap weights
            cb = params[p + 1][...]                   # (1, L2)  f32 bias row
            bn = a.shape[0]
            acc = jnp.zeros((bn, L2), dtype=jnp.float32)
            for t, off in enumerate(tap_offsets):
                # shifted[p] == a[p + off] (cyclic; wrap-around contributions are
                # already zeroed in mw).  Rolls run on the XLU, not the VPU/MXU.
                shifted = a if off == 0 else pltpu.roll(a, shift=(L2 - off) % L2, axis=1)
                acc = acc + shifted * mw[t:t + 1, :]
            a = _softplus(acc + cb)
        o_ref[...] = a.astype(o_ref.dtype)

    return kernel


def prepare_netg_params(l1_w, l1_b, l2_w, l2_b, conv_w=None, conv_b=None,
                        *, smooth_output=False):
    """One-time (hoisted) parameter prep.  PyTorch layouts: l*_w (out, in),
    l*_b (out,), conv_w (1,1,5,5), conv_b (1,)."""
    K, L1 = l1_w.shape
    L2 = l2_w.shape[0]
    L1p = _round_up(L1, 128)                          # lane-dense layer-1 contraction
    w1 = jnp.zeros((L1p, K), jnp.bfloat16).at[:L1, :].set(l1_w.T.astype(jnp.bfloat16))
    b1 = l1_b.reshape(1, K).astype(jnp.float32)
    w2 = l2_w.T.astype(jnp.bfloat16)
    b2 = l2_b.reshape(1, L2).astype(jnp.float32)
    params = dict(L1=L1, L1p=L1p, K=K, L2=L2, smooth=bool(smooth_output),
                  layers=[(w1, b1), (w2, b2)], s=0, tap_offsets=(), conv=None)
    if smooth_output:
        s = int(round(np.sqrt(L2)))
        assert s * s == L2, "smooth_output requires L2 to be a perfect square"
        offsets, masks = _conv5x5_taps(s)
        mw = conv_w.reshape(25, 1).astype(jnp.float32) * jnp.asarray(masks)
        cb = jnp.full((1, L2), conv_b[0], dtype=jnp.float32)
        params.update(s=s, tap_offsets=offsets, conv=(mw, cb))
    return params


def netg_forward(x, params, *, block_rows=512):
    """Fused netG forward: one pallas_call for both Linears, every softplus and
    the optional smoothing conv.  block_rows: batch rows per grid step (keep it
    a multiple of 256 for v6e/v7x MXU fill; on v7x pick it so cdiv(N, block_rows)
    is even so both TensorCores get work)."""
    N = x.shape[0]
    L1, L1p, K, L2 = params["L1"], params["L1p"], params["K"], params["L2"]
    x = x.astype(jnp.float32)
    if L1p != L1:
        x = jnp.pad(x, ((0, 0), (0, L1p - L1)))       # exact: padded W1 rows are 0

    bn = N if N <= block_rows else block_rows         # tiny N: whole batch, grid=(1,)
    grid = (pl.cdiv(N, bn),)

    args = [x]
    in_specs = [pl.BlockSpec((bn, L1p), lambda i: (i, 0))]
    for (W, b) in params["layers"]:                   # resident across the grid
        in_specs.append(pl.BlockSpec(W.shape, lambda i: (0, 0)))
        in_specs.append(pl.BlockSpec(b.shape, lambda i: (0, 0)))
        args += [W, b]
    if params["smooth"]:
        mw, cb = params["conv"]
        in_specs.append(pl.BlockSpec(mw.shape, lambda i: (0, 0)))
        in_specs.append(pl.BlockSpec(cb.shape, lambda i: (0, 0)))
        args += [mw, cb]

    kernel = _make_netg_kernel(len(params["layers"]), params["smooth"],
                               params["s"], params["tap_offsets"])

    # Explicit VMEM budget: double-buffered activation tiles + resident params
    # (conservatively x2 for double-buffering) + f32 intermediates + headroom.
    param_bytes = sum(int(np.prod(a.shape)) * a.dtype.itemsize for a in args[1:])
    act_bytes = bn * (L1p + K + 2 * L2) * 4
    vmem_limit = int(2 * param_bytes + 4 * act_bytes) + (8 << 20)
    vmem_limit = max(16 << 20, min(vmem_limit, 64 << 20))

    return pl.pallas_call(
        kernel,
        out_shape=jax.ShapeDtypeStruct((N, L2), jnp.float32),
        grid_spec=pltpu.PrefetchScalarGridSpec(
            num_scalar_prefetch=0,
            grid=grid,
            in_specs=in_specs,
            out_specs=pl.BlockSpec((bn, L2), lambda i: (i, 0)),
        ),
        compiler_params=pltpu.CompilerParams(
            dimension_semantics=("parallel",),
            vmem_limit_bytes=vmem_limit,
        ),
    )(*args)


def netg_forward_ref(x, l1_w, l1_b, l2_w, l2_b, conv_w=None, conv_b=None,
                     *, smooth_output=False):
    """Pure-JAX reference mirroring the PyTorch forward (f32, highest precision)."""
    with jax.default_matmul_precision("highest"):
        h = jax.nn.softplus(x @ l1_w.T + l1_b)
        out = jax.nn.softplus(h @ l2_w.T + l2_b)
        if smooth_output:
            L2 = out.shape[-1]
            s = int(round(np.sqrt(L2)))
            img = out.reshape(-1, 1, s, s)
            conv = jax.lax.conv_general_dilated(
                img, conv_w, window_strides=(1, 1), padding=((2, 2), (2, 2)),
                dimension_numbers=("NCHW", "OIHW", "NCHW"))
            out = jax.nn.softplus(conv + conv_b.reshape(1, 1, 1, 1)).reshape(-1, L2)
    return out


if __name__ == "__main__":
    # Small shapes consistent with the module: K and L2 lane-dense (multiples
    # of 128) and L2 = 16*16 so the smooth path has a square image.
    N, L1, K, L2 = 16, 32, 128, 256

    key = jax.random.PRNGKey(0)
    ks = jax.random.split(key, 7)
    x = jax.random.normal(ks[0], (N, L1), dtype=jnp.float32)
    l1_w = 0.1 * jax.random.normal(ks[1], (K, L1), dtype=jnp.float32)   # nn.Linear(L1, K)
    l1_b = 0.1 * jax.random.normal(ks[2], (K,), dtype=jnp.float32)
    l2_w = 0.1 * jax.random.normal(ks[3], (L2, K), dtype=jnp.float32)   # nn.Linear(K, L2)
    l2_b = 0.1 * jax.random.normal(ks[4], (L2,), dtype=jnp.float32)
    conv_w = 0.1 * jax.random.normal(ks[5], (1, 1, 5, 5), dtype=jnp.float32)
    conv_b = 0.1 * jax.random.normal(ks[6], (1,), dtype=jnp.float32)

    # smooth_output = False path (all tr_method branches are identical).
    p0 = prepare_netg_params(l1_w, l1_b, l2_w, l2_b, smooth_output=False)
    out0 = jax.block_until_ready(netg_forward(x, p0))
    ref0 = netg_forward_ref(x, l1_w, l1_b, l2_w, l2_b, smooth_output=False)
    assert out0.shape == (N, L2)
    assert jnp.allclose(out0, ref0, atol=5e-2, rtol=5e-2), \
        float(jnp.max(jnp.abs(out0 - ref0)))

    # smooth_output = True path: Conv2d(1,1,5,padding=2) as 25 masked lane rolls.
    p1 = prepare_netg_params(l1_w, l1_b, l2_w, l2_b, conv_w, conv_b,
                             smooth_output=True)
    out1 = jax.block_until_ready(netg_forward(x, p1))
    ref1 = netg_forward_ref(x, l1_w, l1_b, l2_w, l2_b, conv_w, conv_b,
                            smooth_output=True)
    assert out1.shape == (N, L2)
    assert jnp.allclose(out1, ref1, atol=5e-2, rtol=5e-2), \
        float(jnp.max(jnp.abs(out1 - ref1)))

    print("KERNEL_OK")
</pallas_src>

<mosaic_0001>
module attributes {stable_mosaic.version = 11 : i64} {
  func.func @kernel(%arg0: i32, %arg1: memref<16x128xf32, #tpu.memory_space<vmem>>, %arg2: memref<128x128xbf16, #tpu.memory_space<vmem>>, %arg3: memref<1x128xf32, #tpu.memory_space<vmem>>, %arg4: memref<128x256xbf16, #tpu.memory_space<vmem>>, %arg5: memref<1x256xf32, #tpu.memory_space<vmem>>, %arg6: memref<16x256xf32, #tpu.memory_space<vmem>>) attributes {dimension_semantics = [#tpu.dimension_semantics<parallel>], iteration_bounds = array<i64: 1>, scalar_prefetch = 0 : i64, scratch_operands = 0 : i64, tpu.core_type = #tpu.core_type<tc>, window_params = [{transform_indices = @transform_0, window_bounds = array<i64: 16, 128>}, {pipeline_mode = #tpu.pipeline_mode<synchronous>, transform_indices = @transform_1, window_bounds = array<i64: 128, 128>}, {pipeline_mode = #tpu.pipeline_mode<synchronous>, transform_indices = @transform_2, window_bounds = array<i64: 1, 128>}, {pipeline_mode = #tpu.pipeline_mode<synchronous>, transform_indices = @transform_3, window_bounds = array<i64: 128, 256>}, {pipeline_mode = #tpu.pipeline_mode<synchronous>, transform_indices = @transform_4, window_bounds = array<i64: 1, 256>}, {transform_indices = @transform_5, window_bounds = array<i64: 16, 256>}]} {
    %c0 = arith.constant 0 : index
    %c0_0 = arith.constant 0 : index
    %0 = vector.load %arg1[%c0, %c0_0] : memref<16x128xf32, #tpu.memory_space<vmem>>, vector<16x128xf32>
    %1 = arith.truncf %0 : vector<16x128xf32> to vector<16x128xbf16>
    %c0_1 = arith.constant 0 : index
    %c0_2 = arith.constant 0 : index
    %2 = vector.load %arg2[%c0_1, %c0_2] : memref<128x128xbf16, #tpu.memory_space<vmem>>, vector<128x128xbf16>
    %c0_3 = arith.constant 0 : index
    %c0_4 = arith.constant 0 : index
    %3 = vector.load %arg3[%c0_3, %c0_4] : memref<1x128xf32, #tpu.memory_space<vmem>>, vector<1x128xf32>
    %cst = arith.constant dense<0.000000e+00> : vector<16x128xf32>
    %4 = tpu.matmul %1, %2, %cst {dimension_numbers = #tpu.dot_dimension_numbers<[1], [0], [0], [1], [0, 0, 1, 1], [], []>} : vector<16x128xbf16>, vector<128x128xbf16>, vector<16x128xf32> -> vector<16x128xf32>
    %5 = vector.broadcast %3 : vector<1x128xf32> to vector<16x128xf32>
    %6 = arith.addf %4, %5 : vector<16x128xf32>
    %cst_5 = arith.constant 0.000000e+00 : f32
    %7 = vector.broadcast %cst_5 : f32 to vector<16x128xf32>
    %8 = arith.maximumf %6, %7 : vector<16x128xf32>
    %9 = math.absf %6 : vector<16x128xf32>
    %cst_6 = arith.constant 0.000000e+00 : f32
    %10 = vector.broadcast %cst_6 : f32 to vector<16x128xf32>
    %11 = arith.subf %10, %9 : vector<16x128xf32>
    %12 = math.exp %11 : vector<16x128xf32>
    %cst_7 = arith.constant 1.000000e+00 : f32
    %13 = vector.broadcast %cst_7 : f32 to vector<16x128xf32>
    %14 = arith.addf %13, %12 : vector<16x128xf32>
    %15 = math.log %14 : vector<16x128xf32>
    %16 = arith.addf %8, %15 : vector<16x128xf32>
    %17 = arith.truncf %16 : vector<16x128xf32> to vector<16x128xbf16>
    %c0_8 = arith.constant 0 : index
    %c0_9 = arith.constant 0 : index
    %18 = vector.load %arg4[%c0_8, %c0_9] : memref<128x256xbf16, #tpu.memory_space<vmem>>, vector<128x256xbf16>
    %c0_10 = arith.constant 0 : index
    %c0_11 = arith.constant 0 : index
    %19 = vector.load %arg5[%c0_10, %c0_11] : memref<1x256xf32, #tpu.memory_space<vmem>>, vector<1x256xf32>
    %cst_12 = arith.constant dense<0.000000e+00> : vector<16x256xf32>
    %20 = tpu.matmul %17, %18, %cst_12 {dimension_numbers = #tpu.dot_dimension_numbers<[1], [0], [0], [1], [0, 0, 1, 1], [], []>} : vector<16x128xbf16>, vector<128x256xbf16>, vector<16x256xf32> -> vector<16x256xf32>
    %21 = vector.broadcast %19 : vector<1x256xf32> to vector<16x256xf32>
    %22 = arith.addf %20, %21 : vector<16x256xf32>
    %cst_13 = arith.constant 0.000000e+00 : f32
    %23 = vector.broadcast %cst_13 : f32 to vector<16x256xf32>
    %24 = arith.maximumf %22, %23 : vector<16x256xf32>
    %25 = math.absf %22 : vector<16x256xf32>
    %cst_14 = arith.constant 0.000000e+00 : f32
    %26 = vector.broadcast %cst_14 : f32 to vector<16x256xf32>
    %27 = arith.subf %26, %25 : vector<16x256xf32>
    %28 = math.exp %27 : vector<16x256xf32>
    %cst_15 = arith.constant 1.000000e+00 : f32
    %29 = vector.broadcast %cst_15 : f32 to vector<16x256xf32>
    %30 = arith.addf %29, %28 : vector<16x256xf32>
    %31 = math.log %30 : vector<16x256xf32>
    %32 = arith.addf %24, %31 : vector<16x256xf32>
    %c0_16 = arith.constant 0 : index
    %c0_17 = arith.constant 0 : index
    %33 = vector.load %arg6[%c0_16, %c0_17] : memref<16x256xf32, #tpu.memory_space<vmem>>, vector<16x256xf32>
    tpu.vector_store %arg6[%c0_16, %c0_17], %32 {strides = array<i32>} : memref<16x256xf32, #tpu.memory_space<vmem>>, vector<16x256xf32>,
    return
  }
  func.func @transform_0(%arg0: i32) -> (i32, i32) {
    %c0_i32 = arith.constant 0 : i32
    %c0_i32_0 = arith.constant 0 : i32
    return %arg0, %c0_i32 : i32, i32
  }
  func.func @transform_1(%arg0: i32) -> (i32, i32) {
    %c0_i32 = arith.constant 0 : i32
    %c0_i32_0 = arith.constant 0 : i32
    %c0_i32_1 = arith.constant 0 : i32
    return %c0_i32, %c0_i32_0 : i32, i32
  }
  func.func @transform_2(%arg0: i32) -> (i32, i32) {
    %c0_i32 = arith.constant 0 : i32
    %c0_i32_0 = arith.constant 0 : i32
    %c0_i32_1 = arith.constant 0 : i32
    return %c0_i32, %c0_i32_0 : i32, i32
  }
  func.func @transform_3(%arg0: i32) -> (i32, i32) {
    %c0_i32 = arith.constant 0 : i32
    %c0_i32_0 = arith.constant 0 : i32
    %c0_i32_1 = arith.constant 0 : i32
    return %c0_i32, %c0_i32_0 : i32, i32
  }
  func.func @transform_4(%arg0: i32) -> (i32, i32) {
    %c0_i32 = arith.constant 0 : i32
    %c0_i32_0 = arith.constant 0 : i32
    %c0_i32_1 = arith.constant 0 : i32
    return %c0_i32, %c0_i32_0 : i32, i32
  }
  func.func @transform_5(%arg0: i32) -> (i32, i32) {
    %c0_i32 = arith.constant 0 : i32
    %c0_i32_0 = arith.constant 0 : i32
    return %arg0, %c0_i32 : i32, i32
  }
}

</mosaic_0001>

<bundles_post_ra>
// kernel: tpu_custom_call.1
= control target key start
LH: loop header
LB: loop body
LE: loop exit
PB: predicated region body
PF: predicated region fallthrough
CT: control target
= control target key end

     0   :  { %10 = vsyncpa [#allocation3], 0  ;;  %s720_s0 = inlined_call_operand.hbm [shape: f32[16,128], index: 0, kind: input, shape index: {}]   ;;  %s721_s1 = inlined_call_operand.hbm [shape: bf16[128,128], index: 1, kind: input, shape index: {}]   ;;  %s722_s2 = inlined_call_operand.vmem [shape: f32[1,128], index: 2, kind: input, shape index: {}]   ;;  %s723_s3 = inlined_call_operand.hbm [shape: bf16[128,256], index: 3, kind: input, shape index: {}]   ;;  %s724_s4 = inlined_call_operand.vmem [shape: f32[1,256], index: 4, kind: input, shape index: {}]   ;;  %s725_s5 = inlined_call_operand.hbm [shape: f32[16,256], index: 5, kind: output, shape index: {}]  }
   0x1   :  { %11 = vsyncpa [#allocation6], 0 }
   0x2   :  { %12 = vsyncpa [#allocation4], 0  ;;  %s623_s18 = smov [#allocation5]   ;;  %s529_s22 = scalar_lea.hbm %s721_s1, 1024 }
   0x3   :  { %s30_s19 = sshll.u32 %s623_s18, 4  ;;  %p530_p0 = scmp.ne.s32.totalorder %s721_s1, %s529_s22  ;;  %s31_s19 = int_to_ptr.vmem [resolvable:$true] %s30_s19 }
   0x4   :  { %p533_p1 = scmp.lt.u32.totalorder %s529_s22, %s721_s1 }
   0x6   :  { %p535_p2 = pnand %p533_p1, %p530_p0 }
   0x8   :  { %538 = shalt.err (!%p535_p2)
}
   0x9   :  { %s539_s27 = scalar_lea.vmem %s31_s19, 1024  ;;  %p544_p4 = scmp.lt.s32.totalorder %s31_s19, %s31_s19 }
   0xa   :  { %p540_p3 = scmp.ne.s32.totalorder %s31_s19, %s539_s27  ;;  %p545_p5 = scmp.lt.s32.totalorder %s539_s27, %s539_s27 }
   0xc   :  { %p546_p6 = por %p545_p5, %p544_p4 }
   0xe   :  { %p547_p7 = pnand %p546_p6, %p540_p3 }
  0x10   :  { %550 = shalt.err (!%p547_p7)
}
  0x11   :  { %s624_s28 = smov 64   ;;  %s625_s29 = smov 4  }
  0x12   :  { %36 = dma.hbm_to_vmem [thread:$0]  %s721_s1, 1024, %s31_s19, [#allocation6], %s624_s28, %s624_s28, %s625_s29  }
  0x13   :  { %s626_s7 = smov [#allocation2]   ;;  %s551_s11 = scalar_lea.hbm %s720_s0, 256 }
  0x14   :  { %s18_s8 = sshll.u32 %s626_s7, 4  ;;  %p552_p8 = scmp.ne.s32.totalorder %s720_s0, %s551_s11  ;;  %s19_s8 = int_to_ptr.vmem [resolvable:$true] %s18_s8 }
  0x15   :  { %p555_p9 = scmp.lt.u32.totalorder %s551_s11, %s720_s0 }
  0x17   :  { %p557_p10 = pnand %p555_p9, %p552_p8 }
  0x19   :  { %560 = shalt.err (!%p557_p10)
}
  0x1a   :  { %s561_s16 = scalar_lea.vmem %s19_s8, 256  ;;  %p566_p12 = scmp.lt.s32.totalorder %s19_s8, %s19_s8 }
  0x1b   :  { %p562_p11 = scmp.ne.s32.totalorder %s19_s8, %s561_s16  ;;  %p567_p13 = scmp.lt.s32.totalorder %s561_s16, %s561_s16 }
  0x1d   :  { %p568_p0 = por %p567_p13, %p566_p12 }
  0x1f   :  { %p569_p1 = pnand %p568_p0, %p562_p11 }
  0x21   :  { %572 = shalt.err (!%p569_p1)
}
  0x22   :  { %s627_s1 = smov 128   ;;  %s628_s17 = smov 8  }
  0x23   :  { %24 = dma.hbm_to_vmem [thread:$0]  %s720_s0, 256, %s19_s8, [#allocation3], %s627_s1, %s627_s1, %s628_s17  }
  0x24   :  { %s629_s20 = smov [#allocation7]   ;;  %s573_s24 = scalar_lea.hbm %s723_s3, 2048 }
  0x25   :  { %s44_s21 = sshll.u32 %s629_s20, 4  ;;  %p574_p2 = scmp.ne.s32.totalorder %s723_s3, %s573_s24  ;;  %s45_s21 = int_to_ptr.vmem [resolvable:$true] %s44_s21 }
  0x26   :  { %p577_p3 = scmp.lt.u32.totalorder %s573_s24, %s723_s3 }
  0x28   :  { %p579_p4 = pnand %p577_p3, %p574_p2 }
  0x2a   :  { %582 = shalt.err (!%p579_p4)
}
  0x2b   :  { %s583_s29 = scalar_lea.vmem %s45_s21, 2048  ;;  %p588_p6 = scmp.lt.s32.totalorder %s45_s21, %s45_s21 }
  0x2c   :  { %p584_p5 = scmp.ne.s32.totalorder %s45_s21, %s583_s29  ;;  %p589_p7 = scmp.lt.s32.totalorder %s583_s29, %s583_s29 }
  0x2e   :  { %p590_p8 = por %p589_p7, %p588_p6 }
  0x30   :  { %p591_p9 = pnand %p590_p8, %p584_p5 }
  0x32   :  { %594 = shalt.err (!%p591_p9)
}
  0x33   :  { %50 = dma.hbm_to_vmem [thread:$0]  %s723_s3, 2048, %s45_s21, [#allocation6], %s627_s1, %s627_s1, %s628_s17  }
  0x34   :  { %617 = dma.done.wait [#allocation3], 256  }
  0x35   :  { %618 = vsyncadd [#allocation3], 4294967040 }
  0x36   :  { %619 = dma.done.wait [#allocation6], 3072  }
  0x37   :  { %620 = vsyncadd [#allocation6], 4294964224  ;;  %v630_v0 = vmov 0.0   ;;  %vm631_vm0 = vmmov 0   ;;  %v473_v1 = vld [vmem:[#allocation5] sm:$0xff]   ;;  %v474_v2 = vld [vmem:[#allocation5 + $0x8] sm:$0xff]   ;;  %v215_v55 = vlaneseq }
  0x38   :  { %440 = vmatprep.subr.bf16.mxu0 %v630_v0  ;;  %456 = vmatprep.mubr.msk.bf16.mxu0 %vm631_vm0, %v630_v0  ;;  %v475_v3 = vld [vmem:[#allocation5 + $0x10] sm:$0xff]   ;;  %v476_v4 = vld [vmem:[#allocation5 + $0x18] sm:$0xff]   ;;  %v477_v5 = vld [vmem:[#allocation5 + $0x20] sm:$0xff]   ;;  %v632_v28 = vmov 0  }
  0x39   :  { %441 = vmatpush3.bf16.msra.mxu0 %v473_v1  ;;  %v478_v6 = vld [vmem:[#allocation5 + $0x28] sm:$0xff]   ;;  %v479_v7 = vld [vmem:[#allocation5 + $0x30] sm:$0xff]   ;;  %v480_v8 = vld [vmem:[#allocation5 + $0x38] sm:$0xff]   ;;  %337 = vmatprep.mubr.bf16.mxu1 %v632_v28  ;;  %v216_v56 = vshrl.u32 %v215_v55, 7 }
  0x3a   :  { %442 = vmatprep.subr.bf16.mxu0 %v630_v0  ;;  %v63_v9 = vld [vmem:[#allocation2] sm:$0xff]  ;;  %v64_v10 = vld [vmem:[#allocation2 + $0x8] sm:$0xff]  ;;  %v481_v12 = vld [vmem:[#allocation7 + $0x4] ss:$8 sps:$4 sm:$0xff]  }
  0x3b   :  { %v65_v11 = vpack.c.bf16 %v64_v10, %v63_v9  ;;  %v483_v13 = vld [vmem:[#allocation7] ss:$8 sps:$4 sm:$0xff]   ;;  %305 = vmatprep.subr.bf16.mxu1 %v481_v12  ;;  %v484_v14 = vld [vmem:[#allocation7 + $0x14] ss:$8 sps:$4 sm:$0xff]   ;;  %v486_v15 = vld [vmem:[#allocation7 + $0x10] ss:$8 sps:$4 sm:$0xff]  }
  0x3c   :  { %306 = vmatpush1.bf16.msra.mxu1 %v483_v13  ;;  %v487_v16 = vld [vmem:[#allocation7 + $0x24] ss:$8 sps:$4 sm:$0xff]   ;;  %v489_v17 = vld [vmem:[#allocation7 + $0x20] ss:$8 sps:$4 sm:$0xff]   ;;  %v490_v18 = vld [vmem:[#allocation7 + $0x34] ss:$8 sps:$4 sm:$0xff]  }
  0x3d   :  { %443 = vmatpush3.bf16.msra.mxu0 %v474_v2  ;;  %307 = vmatprep.subr.bf16.mxu1 %v484_v14  ;;  %v492_v19 = vld [vmem:[#allocation7 + $0x30] ss:$8 sps:$4 sm:$0xff]   ;;  %v493_v20 = vld [vmem:[#allocation7 + $0x44] ss:$8 sps:$4 sm:$0xff]   ;;  %v495_v21 = vld [vmem:[#allocation7 + $0x40] ss:$8 sps:$4 sm:$0xff]  }
  0x3e   :  { %444 = vmatprep.subr.bf16.mxu0 %v630_v0  ;;  %v496_v22 = vld [vmem:[#allocation7 + $0x54] ss:$8 sps:$4 sm:$0xff]   ;;  %v498_v23 = vld [vmem:[#allocation7 + $0x50] ss:$8 sps:$4 sm:$0xff]   ;;  %v499_v24 = vld [vmem:[#allocation7 + $0x64] ss:$8 sps:$4 sm:$0xff]  }
  0x3f   :  { %v501_v25 = vld [vmem:[#allocation7 + $0x60] ss:$8 sps:$4 sm:$0xff]   ;;  %v502_v26 = vld [vmem:[#allocation7 + $0x74] ss:$8 sps:$4 sm:$0xff]   ;;  %v504_v27 = vld [vmem:[#allocation7 + $0x70] ss:$8 sps:$4 sm:$0xff]  }
  0x40   :  { %308 = vmatpush1.bf16.msra.mxu1 %v486_v15  ;;  %v406_v29 = vld [vmem:[%s722_s2] ss:$0 sm:$0xff]  ;;  %v217_v57 = vsub.s32 0, %v216_v56  ;;  %v221_v59 = vsub.s32 1, %v216_v56 }
  0x41   :  { %445 = vmatpush3.bf16.msra.mxu0 %v475_v3  ;;  %309 = vmatprep.subr.bf16.mxu1 %v487_v16  ;;  %v213_v58 = vld [vmem:[%s724_s4] sm:$0x3]  ;;  %s633_s4 = smov [#allocation8]  }
  0x42   :  { %446 = vmatprep.subr.bf16.mxu0 %v630_v0  ;;  %v218_v60 = vrot.slane %v213_v58, %v217_v57  ;;  %v222_v61 = vrot.slane %v213_v58, %v221_v59  ;;  %s393_s8 = sshll.u32 %s633_s4, 4  ;;  %s394_s8 = int_to_ptr.vmem [resolvable:$true] %s393_s8 }
  0x43   :  { %s595_s9 = scalar_lea.vmem %s394_s8, 512  ;;  %p600_p11 = scmp.lt.s32.totalorder %s394_s8, %s394_s8 }
  0x44   :  { %310 = vmatpush1.bf16.msra.mxu1 %v489_v17  ;;  %p596_p10 = scmp.ne.s32.totalorder %s394_s8, %s595_s9  ;;  %p601_p12 = scmp.lt.s32.totalorder %s595_s9, %s595_s9 }
  0x45   :  { %447 = vmatpush3.bf16.msra.mxu0 %v476_v4  ;;  %311 = vmatprep.subr.bf16.mxu1 %v490_v18 }
  0x46   :  { %448 = vmatprep.subr.bf16.mxu0 %v630_v0  ;;  %p602_p13 = por %p601_p12, %p600_p11 }
  0x48   :  { %312 = vmatpush1.bf16.msra.mxu1 %v492_v19  ;;  %p603_p0 = pnand %p602_p13, %p596_p10 }
  0x49   :  { %449 = vmatpush3.bf16.msra.mxu0 %v477_v5  ;;  %313 = vmatprep.subr.bf16.mxu1 %v493_v20 }
  0x4a   :  { %450 = vmatprep.subr.bf16.mxu0 %v630_v0 }
  0x4c   :  { %314 = vmatpush1.bf16.msra.mxu1 %v495_v21 }
  0x4d   :  { %451 = vmatpush3.bf16.msra.mxu0 %v478_v6  ;;  %315 = vmatprep.subr.bf16.mxu1 %v496_v22 }
  0x4e   :  { %452 = vmatprep.subr.bf16.mxu0 %v630_v0 }
  0x50   :  { %316 = vmatpush1.bf16.msra.mxu1 %v498_v23 }
  0x51   :  { %453 = vmatpush3.bf16.msra.mxu0 %v479_v7  ;;  %317 = vmatprep.subr.bf16.mxu1 %v499_v24 }
  0x52   :  { %454 = vmatprep.subr.bf16.mxu0 %v630_v0 }
  0x54   :  { %318 = vmatpush1.bf16.msra.mxu1 %v501_v25 }
  0x55   :  { %455 = vmatpush3.bf16.msra.mxu0 %v480_v8  ;;  %319 = vmatprep.subr.bf16.mxu1 %v502_v26 }
  0x58   :  { %457 = vmatmul.mubr.bf16.vlgmr.msra.gmra.mrb[0].mxu0 %v65_v11  ;;  %320 = vmatpush1.bf16.msra.mxu1 %v504_v27 }
 0x12b   :  { %v171_v30 = vpop.f32.mrb[0].mxu0 }
 0x12c   :  { %v172_v31 = vadd.f32 %v406_v29, %v171_v30  ;;  %v458_v32 = vpop.f32.mrb[1].mxu0 }
 0x12d   :  { %v174_v33 = vpop.f32.mrb[2].mxu0 }
 0x12e   :  { %v180_v34 = vand.u32 2147483647, %v172_v31  ;;  %v175_v35 = vadd.f32 %v406_v29, %v174_v33  ;;  %v459_v36 = vpop.f32.mrb[3].mxu0  ;;  %v178_v49 = vmax.f32 %v172_v31, 0.0 }
 0x130   :  { %v182_v37 = vsub.f32 0.0, %v180_v34  ;;  %v181_v38 = vand.u32 2147483647, %v175_v35  ;;  %v179_v50 = vmax.f32 %v175_v35, 0.0 }
 0x132   :  { %v184_v39 = vmul.f32 1.442695, %v182_v37  ;;  %v183_v40 = vsub.f32 0.0, %v181_v38 }
 0x134   :  { %505 = vpow2.f32 %v184_v39  ;;  %v186_v41 = vmul.f32 1.442695, %v183_v40 }
 0x136   :  { %507 = vpow2.f32 %v186_v41 }
 0x13e   :  { %v506_v42 = vpop.eup %505 }
 0x13f   :  { %v188_v43 = vadd.f32 1.0, %v506_v42 }
 0x140   :  { %v508_v44 = vpop.eup %507 }
 0x141   :  { %509 = vlog2.f32 %v188_v43  ;;  %v189_v45 = vadd.f32 1.0, %v508_v44 }
 0x143   :  { %511 = vlog2.f32 %v189_v45 }
 0x14b   :  { %v510_v46 = vpop.eup %509 }
 0x14c   :  { %v191_v47 = vmul.f32 0.6931472, %v510_v46 }
 0x14d   :  { %v512_v48 = vpop.eup %511 }
 0x14e   :  { %v193_v51 = vmul.f32 0.6931472, %v512_v48  ;;  %v194_v52 = vadd.f32 %v191_v47, %v178_v49 }
 0x150   :  { %v195_v53 = vadd.f32 %v193_v51, %v179_v50 }
 0x152   :  { %v196_v54 = vpack.c.bf16 %v195_v53, %v194_v52 }
 0x154   :  { %338 = vmatmul.mubr.bf16.vlgmr.msra.gmra.mrb[0].mxu1 %v196_v54 }
 0x227   :  { %v339_v62 = vpop.f32.mrb[0].mxu1 }
 0x228   :  { %v340_v63 = vadd.f32 %v339_v62, %v218_v60  ;;  %v341_v0 = vpop.f32.mrb[1].mxu1 }
 0x229   :  { %v342_v1 = vadd.f32 %v341_v0, %v222_v61  ;;  %v343_v2 = vpop.f32.mrb[2].mxu1 }
 0x22a   :  { %v352_v3 = vand.u32 2147483647, %v340_v63  ;;  %v344_v4 = vadd.f32 %v343_v2, %v218_v60  ;;  %v345_v5 = vpop.f32.mrb[3].mxu1  ;;  %v348_v28 = vmax.f32 %v340_v63, 0.0 }
 0x22b   :  { %v353_v6 = vand.u32 2147483647, %v342_v1  ;;  %v346_v7 = vadd.f32 %v345_v5, %v222_v61  ;;  %v349_v31 = vmax.f32 %v342_v1, 0.0 }
 0x22c   :  { %v356_v8 = vsub.f32 0.0, %v352_v3  ;;  %v354_v9 = vand.u32 2147483647, %v344_v4  ;;  %v350_v35 = vmax.f32 %v344_v4, 0.0 }
 0x22d   :  { %v357_v10 = vsub.f32 0.0, %v353_v6  ;;  %v355_v11 = vand.u32 2147483647, %v346_v7  ;;  %v351_v38 = vmax.f32 %v346_v7, 0.0 }
 0x22e   :  { %v360_v12 = vmul.f32 1.442695, %v356_v8  ;;  %v358_v13 = vsub.f32 0.0, %v354_v9 }
 0x22f   :  { %v362_v14 = vmul.f32 1.442695, %v357_v10  ;;  %v359_v15 = vsub.f32 0.0, %v355_v11 }
 0x230   :  { %513 = vpow2.f32 %v360_v12  ;;  %v364_v16 = vmul.f32 1.442695, %v358_v13 }
 0x231   :  { %515 = vpow2.f32 %v362_v14  ;;  %v366_v17 = vmul.f32 1.442695, %v359_v15 }
 0x232   :  { %517 = vpow2.f32 %v364_v16 }
 0x233   :  { %519 = vpow2.f32 %v366_v17 }
 0x23a   :  { %v514_v18 = vpop.eup %513 }
 0x23b   :  { %v516_v19 = vpop.eup %515  ;;  %v368_v20 = vadd.f32 1.0, %v514_v18 }
 0x23c   :  { %v518_v21 = vpop.eup %517  ;;  %v369_v22 = vadd.f32 1.0, %v516_v19 }
 0x23d   :  { %v520_v23 = vpop.eup %519  ;;  %521 = vlog2.f32 %v368_v20  ;;  %v370_v24 = vadd.f32 1.0, %v518_v21 }
 0x23e   :  { %523 = vlog2.f32 %v369_v22  ;;  %v371_v25 = vadd.f32 1.0, %v520_v23 }
 0x23f   :  { %525 = vlog2.f32 %v370_v24 }
 0x240   :  { %527 = vlog2.f32 %v371_v25 }
 0x247   :  { %v522_v26 = vpop.eup %521 }
 0x248   :  { %v524_v27 = vpop.eup %523  ;;  %v373_v29 = vmul.f32 0.6931472, %v522_v26 }
 0x249   :  { %v526_v30 = vpop.eup %525  ;;  %v375_v32 = vmul.f32 0.6931472, %v524_v27 }
 0x24a   :  { %v528_v33 = vpop.eup %527  ;;  %v380_v34 = vadd.f32 %v373_v29, %v348_v28  ;;  %v377_v36 = vmul.f32 0.6931472, %v526_v30 }
 0x24b   :  { %v381_v37 = vadd.f32 %v375_v32, %v349_v31  ;;  %v379_v39 = vmul.f32 0.6931472, %v528_v33 }
 0x24c   :  { %384 = vst [vmem:[#allocation8] sm:$0xff] %v380_v34  ;;  %v382_v40 = vadd.f32 %v377_v36, %v350_v35 }
 0x24d   :  { %385 = vst [vmem:[#allocation8 + $0x8] sm:$0xff] %v381_v37  ;;  %v383_v41 = vadd.f32 %v379_v39, %v351_v38 }
 0x24e   :  { %386 = vst [vmem:[#allocation8 + $0x10] sm:$0xff] %v382_v40 }
 0x24f   :  { %387 = vst [vmem:[#allocation8 + $0x18] sm:$0xff] %v383_v41 }
 0x250   :  { %606 = shalt.err (!%p603_p0)
}
 0x251   :  { %s607_s12 = scalar_lea.hbm %s725_s5, 512 }
 0x252   :  { %p608_p1 = scmp.ne.s32.totalorder %s725_s5, %s607_s12  ;;  %p611_p2 = scmp.lt.u32.totalorder %s607_s12, %s725_s5 }
 0x254   :  { %p613_p3 = pnand %p611_p2, %p608_p1 }
 0x256   :  { %616 = shalt.err (!%p613_p3)
}
 0x257   :  { %s634_s1 = smov 256   ;;  %s635_s17 = smov 16  }
 0x258   :  { %399 = dma.vmem_to_hbm [thread:$0]  %s394_s8, 512, %s725_s5, [#allocation4], %s634_s1, %s634_s1, %s635_s17  }
 0x259   :  { %621 = dma.done.wait [#allocation4], 512  }
 0x25a   :  { %622 = vsyncadd [#allocation4], 4294966784 }
 0x25b   :  { %403 = vsyncpa [#allocation3], 1 }
 0x25c   :  { %404 = vsyncpa [#allocation6], 1 }
 0x25d   :  { %405 = vsyncpa [#allocation4], 1 }

</bundles_post_ra>
